<compile_context>
chip_gen: v5e
topology: v5e:2x2
jax: 0.10.0
libtpu: 0.0.40
codegen_flags: <defaults>
</compile_context>

<pallas_src>
import functools

import jax
import jax.numpy as jnp
from jax.experimental import pallas as pl
from jax.experimental.pallas import tpu as pltpu


def _conv1x1_prelu_kernel(x_ref, w_ref, b_ref, alpha_ref, o_ref):
    # x_ref:     (1, C, T)    VMEM   (per-sample activation tile, lane-dense)
    # w_ref:     (Cout, C)    VMEM   (full 1x1-conv weight, resident)
    # b_ref:     (Cout, 1)    VMEM   (bias, broadcast along lanes)
    # alpha_ref: (1,)         SMEM   (shared PReLU slope, scalar read)
    # o_ref:     (1, Cout, T) VMEM
    y = jnp.dot(w_ref[...], x_ref[0],
                preferred_element_type=jnp.float32)        # (Cout, T) on MXU
    y = y + b_ref[...]                                     # bias broadcast
    a = alpha_ref[0]                                       # scalar from SMEM
    o_ref[0] = jnp.where(y > 0, y, a * y).astype(o_ref.dtype)


def _pick_hw_tile(hw, c_in, c_out, *, max_tile=4096, vmem_budget_bytes=6 << 20):
    """Largest lane-dense token tile whose double-buffered in+out blocks fit
    comfortably under every generation's scoped-VMEM default (v7x = 64 MiB
    physical is the tightest, so we stay conservative)."""
    bytes_per_token = 2 * (c_in + c_out) * 4   # 2 pipeline buffers, f32 in+out
    t = min(max_tile, max(128, vmem_budget_bytes // bytes_per_token))
    t = (t // 128) * 128
    if hw <= t:
        return hw                              # full extent: always layout-legal
    return t


def conv1x1_prelu(x3, w, b, alpha, *, hw_tile=None):
    """x3: (N, C, HW) f32, w: (Cout, C), b: (Cout,), alpha: scalar.
    Returns (N, Cout, HW) f32 = PReLU(W @ x + b) per sample."""
    N, C, HW = x3.shape
    Cout = w.shape[0]

    if hw_tile is None:
        hw_tile = _pick_hw_tile(HW, C, Cout)
        # Keep >= 2 grid steps so both v7x TensorCores get work.
        if N * pl.cdiv(HW, hw_tile) < 2 and HW >= 256:
            hw_tile = max(128, ((HW // 2) // 128) * 128)

    grid = (N, pl.cdiv(HW, hw_tile))

    return pl.pallas_call(
        _conv1x1_prelu_kernel,
        out_shape=jax.ShapeDtypeStruct((N, Cout, HW), jnp.float32),
        grid_spec=pltpu.PrefetchScalarGridSpec(
            num_scalar_prefetch=0,
            grid=grid,
            in_specs=[
                pl.BlockSpec((1, C, hw_tile), lambda n, t: (n, 0, t)),
                pl.BlockSpec((Cout, C), lambda n, t: (0, 0)),
                pl.BlockSpec((Cout, 1), lambda n, t: (0, 0)),
                pl.BlockSpec(memory_space=pltpu.MemorySpace.SMEM),
            ],
            out_specs=pl.BlockSpec((1, Cout, hw_tile), lambda n, t: (n, 0, t)),
        ),
        compiler_params=pltpu.CompilerParams(
            dimension_semantics=("parallel", "parallel")),
    )(x3, w, b.reshape(Cout, 1), alpha.reshape(1))


def upsample_block(x_nchw, conv_w, conv_b, prelu_alpha, scale):
    """Forward pass of UpsampleBlock.

    x_nchw:      (N, C, H, W)
    conv_w:      (Cout, C, 1, 1) with Cout = C * scale**2  (PyTorch Conv2d layout)
    conv_b:      (Cout,)
    prelu_alpha: scalar (nn.PReLU() default single parameter)
    returns:     (N, C, H*scale, W*scale)  (NCHW, same as PyTorch)
    """
    N, C, H, W = x_nchw.shape
    r = scale
    Cout = C * r * r
    assert conv_w.shape == (Cout, C, 1, 1)

    x3 = x_nchw.reshape(N, C, H * W)           # free reshape: HW contiguous in NCHW
    w = conv_w.reshape(Cout, C)                # already (Cout, C); no transpose
    alpha = jnp.asarray(prelu_alpha, jnp.float32)

    # Hot path: per-sample W @ X matmul + bias + PReLU, lane-dense in/out.
    y = conv1x1_prelu(x3, w, conv_b, alpha)    # (N, Cout, H*W)

    # PixelShuffle glue (pure permutation; single-alpha PReLU commutes with it):
    # out[n, c, h*r+i, w*r+j] = y[n, c*r*r + i*r + j, h*W + w]
    y = y.reshape(N, C, r, r, H, W)
    y = jnp.transpose(y, (0, 1, 4, 2, 5, 3))   # (N, C, H, r, W, r)
    return y.reshape(N, C, H * r, W * r)


def _reference(x_nchw, conv_w, conv_b, prelu_alpha, scale):
    """Pure-JAX reference mirroring the PyTorch module."""
    N, C, H, W = x_nchw.shape
    r = scale
    Cout = C * r * r
    w = conv_w.reshape(Cout, C)
    y = jnp.einsum('nchw,oc->nohw', x_nchw, w) + conv_b[None, :, None, None]
    y = y.reshape(N, C, r, r, H, W)
    y = jnp.transpose(y, (0, 1, 4, 2, 5, 3)).reshape(N, C, H * r, W * r)
    return jnp.where(y > 0, y, prelu_alpha * y)


if __name__ == "__main__":
    key = jax.random.PRNGKey(0)
    k1, k2, k3 = jax.random.split(key, 3)

    # Small shapes consistent with the module.
    N, C, H, W = 2, 4, 16, 16
    scale = 2
    Cout = C * scale * scale

    x = jax.random.normal(k1, (N, C, H, W), dtype=jnp.float32)
    conv_w = jax.random.normal(k2, (Cout, C, 1, 1), dtype=jnp.float32) * 0.1
    conv_b = jax.random.normal(k3, (Cout,), dtype=jnp.float32) * 0.1
    prelu_alpha = jnp.asarray(0.25, dtype=jnp.float32)  # nn.PReLU default init

    fwd = jax.jit(functools.partial(upsample_block, scale=scale))
    out = jax.block_until_ready(fwd(x, conv_w, conv_b, prelu_alpha))

    ref = _reference(x, conv_w, conv_b, prelu_alpha, scale)
    assert out.shape == (N, C, H * scale, W * scale), out.shape
    assert jnp.allclose(out, ref, atol=1e-5, rtol=1e-5), "mismatch vs reference"

    print("KERNEL_OK")
</pallas_src>

<mosaic_0001>
module attributes {stable_mosaic.version = 11 : i64} {
  func.func @_conv1x1_prelu_kernel(%arg0: i32, %arg1: i32, %arg2: memref<1x4x256xf32, #tpu.memory_space<vmem>>, %arg3: memref<16x4xf32, #tpu.memory_space<vmem>>, %arg4: memref<16x1xf32, #tpu.memory_space<vmem>>, %arg5: memref<1xf32, #tpu.memory_space<smem>>, %arg6: memref<1x16x256xf32, #tpu.memory_space<vmem>>) attributes {dimension_semantics = [#tpu.dimension_semantics<parallel>, #tpu.dimension_semantics<parallel>], iteration_bounds = array<i64: 2, 1>, scalar_prefetch = 0 : i64, scratch_operands = 0 : i64, tpu.core_type = #tpu.core_type<tc>, window_params = [{transform_indices = @transform_0, window_bounds = array<i64: 1, 4, 256>}, {pipeline_mode = #tpu.pipeline_mode<synchronous>, transform_indices = @transform_1, window_bounds = array<i64: 16, 4>}, {pipeline_mode = #tpu.pipeline_mode<synchronous>, transform_indices = @transform_2, window_bounds = array<i64: 16, 1>}, {transform_indices = @transform_3, window_bounds = array<i64: 1>}, {transform_indices = @transform_4, window_bounds = array<i64: 1, 16, 256>}]} {
    %c0 = arith.constant 0 : index
    %c0_0 = arith.constant 0 : index
    %0 = vector.load %arg3[%c0, %c0_0] : memref<16x4xf32, #tpu.memory_space<vmem>>, vector<16x4xf32>
    %c0_1 = arith.constant 0 : index
    %c0_2 = arith.constant 0 : index
    %c0_3 = arith.constant 0 : index
    %1 = vector.load %arg2[%c0_1, %c0_2, %c0_3] : memref<1x4x256xf32, #tpu.memory_space<vmem>>, vector<1x4x256xf32>
    %2 = vector.shape_cast %1 : vector<1x4x256xf32> to vector<4x256xf32>
    %cst = arith.constant dense<0.000000e+00> : vector<16x256xf32>
    %3 = tpu.matmul %0, %2, %cst {dimension_numbers = #tpu.dot_dimension_numbers<[1], [0], [0], [1], [0, 0, 1, 1], [], []>} : vector<16x4xf32>, vector<4x256xf32>, vector<16x256xf32> -> vector<16x256xf32>
    %c0_4 = arith.constant 0 : index
    %c0_5 = arith.constant 0 : index
    %4 = vector.load %arg4[%c0_4, %c0_5] : memref<16x1xf32, #tpu.memory_space<vmem>>, vector<16x1xf32>
    %5 = vector.broadcast %4 : vector<16x1xf32> to vector<16x256xf32>
    %6 = arith.addf %3, %5 : vector<16x256xf32>
    %c0_6 = arith.constant 0 : index
    %7 = memref.load %arg5[%c0_6] : memref<1xf32, #tpu.memory_space<smem>>
    %cst_7 = arith.constant 0.000000e+00 : f32
    %8 = vector.broadcast %cst_7 : f32 to vector<16x256xf32>
    %9 = arith.cmpf ogt, %6, %8 : vector<16x256xf32>
    %10 = vector.broadcast %7 : f32 to vector<16x256xf32>
    %11 = arith.mulf %10, %6 : vector<16x256xf32>
    %12 = arith.select %9, %6, %11 : vector<16x256xi1>, vector<16x256xf32>
    %c0_8 = arith.constant 0 : index
    %c0_9 = arith.constant 0 : index
    %c0_10 = arith.constant 0 : index
    %13 = vector.load %arg6[%c0_8, %c0_9, %c0_10] : memref<1x16x256xf32, #tpu.memory_space<vmem>>, vector<1x16x256xf32>
    %14 = vector.shape_cast %13 : vector<1x16x256xf32> to vector<16x256xf32>
    %15 = vector.shape_cast %12 : vector<16x256xf32> to vector<1x16x256xf32>
    tpu.vector_store %arg6[%c0_8, %c0_9, %c0_10], %15 {strides = array<i32>} : memref<1x16x256xf32, #tpu.memory_space<vmem>>, vector<1x16x256xf32>,
    return
  }
  func.func @transform_0(%arg0: i32, %arg1: i32) -> (i32, i32, i32) {
    %c0_i32 = arith.constant 0 : i32
    %c0_i32_0 = arith.constant 0 : i32
    return %arg0, %c0_i32, %arg1 : i32, i32, i32
  }
  func.func @transform_1(%arg0: i32, %arg1: i32) -> (i32, i32) {
    %c0_i32 = arith.constant 0 : i32
    %c0_i32_0 = arith.constant 0 : i32
    %c0_i32_1 = arith.constant 0 : i32
    return %c0_i32, %c0_i32_0 : i32, i32
  }
  func.func @transform_2(%arg0: i32, %arg1: i32) -> (i32, i32) {
    %c0_i32 = arith.constant 0 : i32
    %c0_i32_0 = arith.constant 0 : i32
    %c0_i32_1 = arith.constant 0 : i32
    return %c0_i32, %c0_i32_0 : i32, i32
  }
  func.func @transform_3(%arg0: i32, %arg1: i32) -> i32 {
    %c0_i32 = arith.constant 0 : i32
    %c0_i32_0 = arith.constant 0 : i32
    return %c0_i32 : i32
  }
  func.func @transform_4(%arg0: i32, %arg1: i32) -> (i32, i32, i32) {
    %c0_i32 = arith.constant 0 : i32
    %c0_i32_0 = arith.constant 0 : i32
    return %arg0, %c0_i32, %arg1 : i32, i32, i32
  }
}

</mosaic_0001>

<bundles_post_ra>
// kernel: upsample_block.1
= control target key start
LH: loop header
LB: loop body
LE: loop exit
PB: predicated region body
PF: predicated region fallthrough
CT: control target
= control target key end

     0   :  { %s520_s17 = smov 0   ;;  %s522_s18 = smov 0   ;;  %s569_s0 = inlined_call_operand.vmem [shape: f32[2,4,256], index: 0, kind: input, shape index: {}]   ;;  %s570_s1 = inlined_call_operand.vmem [shape: f32[16,4], index: 1, kind: input, shape index: {}]   ;;  %s571_s2 = inlined_call_operand.vmem [shape: f32[16,1], index: 2, kind: input, shape index: {}]   ;;  %s572_s3 = inlined_call_operand.<no memory space> [shape: f32[1], index: 3, kind: input, shape index: {}]   ;;  %s573_s4 = inlined_call_operand.vmem [shape: f32[2,16,256], index: 4, kind: output, shape index: {}]  }
   0x1   :  { %9 = sst [smem:[#allocation2]] %s572_s3  ;;  %s524_s19 = smov 0  }
   0x2 LB: > { %s27_s3 = sadd.s32 1, %s485_s18  ;;  %p424_p0 = scmp.ge.s32.totalorder %s489_s19, 1  ;;  %s489_s19 = sphi %s524_s19, %s15_s19   ;;  %s485_s18 = sphi %s522_s18, %s575_s18   ;;  %s481_s17 = sphi %s520_s17, %s574_s17  }
   0x3   : > { %p29_p1 = scmp.ge.s32.totalorder %s27_s3, 2  ;;  %p184_p2 = scmp.lt.s32.totalorder %s489_s19, 3 }
   0x5   : > { %s577_s3 = smov (%p29_p1, %s27_s3), 0  ;;  %p185_p3 = pnand %p424_p0, %p184_p2 }
   0x6   : > { %p219_p4 = scmp.lt.s32.totalorder (!%p185_p3), %s481_s17, 1  ;;  %s315_s6 = sld [smem:[#allocation2]] (!%p185_p3) }
   0x7   : > { %188 = sbr.rel (%p185_p3) target bundleno = 165 (0xa5), region = 36 }
   0xc   : > { %v491_v0 = vmov 0   ;;  %v241_v1 = vld [vmem:[%s571_s2] sm:$0xff]  ;;  %s579_s17 = smov (!%p219_p4, %s481_s17), 1  ;;  %v242_v3 = vld [vmem:[%s571_s2 + $0x8] sm:$0xff]  ;;  %vm264_vm0 = vcmask 1043456   ;;  %vm257_vm1 = vcmask 31744   ;;  %v320_v10 = vstv %s315_s6 }
   0xd   : > { %466 = vset.pattern.permute.xlu0 %v491_v0  ;;  %s437_s22 = sshll.u32 %s579_s17, 3  ;;  %v238_v4 = vld [vmem:[%s570_s1] sm:$0xff]  ;;  %v239_v5 = vld [vmem:[%s570_s1 + $0x8] sm:$0xff]  ;;  %s438_s7 = sshll.u32 %s579_s17, 5 }
   0xe   : > { %245 = vperm.xlu0 %466, %v241_v1   ;;  %s226_s25 = scalar_lea.vmem %s569_s0, %s437_s22  ;;  %s236_s10 = scalar_lea.vmem %s573_s4, %s438_s7 }
   0xf   : > { %v240_v2 = vld [vmem:[%s226_s25] sm:$0xff] }
  0x10   : > { %254 = vst [vmem:[#allocation1] ss:$2 sm:$0xff] %v240_v2 }
  0x16   : > { %250 = vperm.xlu0 %466, %v242_v3  }
  0x17   : > { %v255_v6 = vld.sshfl [vmem:[#allocation1] sm:$0xff pattern:$0x75316420]  ;;  %v256_v7 = vld.sshfl [vmem:[#allocation1 + $0x8] sm:$0xff pattern:$0x75316420] }
  0x18   : > { %429 = vmatpush.msk.msra.mxu0 %vm264_vm0, %v255_v6  ;;  %439 = vmatpush.msk.msra.mxu2 %vm264_vm0, %v255_v6 }
  0x19   : > { %432 = vmatpush.msk.msra.mxu1 %vm264_vm0, %v256_v7  ;;  %440 = vmatpush.msk.msra.mxu3 %vm264_vm0, %v256_v7 }
  0x1a   : > { %430 = vmatmul.msk.f32.vlgmr.msra.gmra.mxu0 %vm257_vm1, %v238_v4  ;;  %431 = vmatmul.msk.f32.vlgmr.msra.gmra.mxu2 %vm257_vm1, %v239_v5 }
  0x1b   : > { %433 = vmatmul.msk.f32.vlgmr.msra.gmra.mxu1 %vm257_vm1, %v238_v4  ;;  %434 = vmatmul.msk.f32.vlgmr.msra.gmra.mxu3 %vm257_vm1, %v239_v5 }
  0x80   : > { %v246_v8 = vpop.permute.xlu0 %245 }
  0x88   : > { %v251_v17 = vpop.permute.xlu0 %250 }
  0x97   : > { %v286_v9 = vpop.f32.mrf.mxu0 }
  0x98   : > { %v287_v11 = vadd.f32 %v286_v9, %v246_v8  ;;  %v309_v12 = vpop.f32.mrf.mxu1 }
  0x99   : > { %v310_v13 = vadd.f32 %v309_v12, %v246_v8 }
  0x9a   : > { %vm316_vm2 = vcmp.gt.f32.partialorder %v287_v11, 0.0  ;;  %v321_v14 = vmul.f32 %v320_v10, %v287_v11 }
  0x9b   : > { %vm317_vm3 = vcmp.gt.f32.partialorder %v310_v13, 0.0  ;;  %v322_v15 = vmul.f32 %v320_v10, %v310_v13 }
  0x9c   : > { %v325_v16 = vsel %vm316_vm2, %v287_v11, %v321_v14 }
  0x9d   : > { %329 = vst [vmem:[%s236_s10] sm:$0xff] %v325_v16  ;;  %v326_v18 = vsel %vm317_vm3, %v310_v13, %v322_v15  ;;  %v289_v19 = vpop.f32.mrf.mxu2 }
  0x9e   : > { %330 = vst [vmem:[%s236_s10 + $0x8] sm:$0xff] %v326_v18  ;;  %v290_v20 = vadd.f32 %v289_v19, %v251_v17  ;;  %v312_v21 = vpop.f32.mrf.mxu3 }
  0x9f   : > { %v313_v22 = vadd.f32 %v312_v21, %v251_v17 }
  0xa0   : > { %vm318_vm4 = vcmp.gt.f32.partialorder %v290_v20, 0.0  ;;  %v323_v23 = vmul.f32 %v320_v10, %v290_v20 }
  0xa1   : > { %vm319_vm5 = vcmp.gt.f32.partialorder %v313_v22, 0.0  ;;  %v324_v24 = vmul.f32 %v320_v10, %v313_v22 }
  0xa2   : > { %v327_v25 = vsel %vm318_vm4, %v290_v20, %v323_v23 }
  0xa3   : > { %331 = vst [vmem:[%s236_s10 + $0x10] sm:$0xff] %v327_v25  ;;  %v328_v26 = vsel %vm319_vm5, %v313_v22, %v324_v24 }
  0xa4   : > { %332 = vst [vmem:[%s236_s10 + $0x18] sm:$0xff] %v328_v26 }
  0xa5 PF: > { %s15_s19 = sadd.s32 1, %s489_s19   ;;  %s574_s17 = smov %s485_s18 }
  0xa6   : > { %p12_p5 = scmp.ge.s32.totalorder %s15_s19, 4   ;;  %s575_s18 = smov %s577_s3 }
  0xa8   :  { %14 = sbr.rel (!%p12_p5) target bundleno = 2 (0x2), region = 66 }

</bundles_post_ra>
